<compile_context>
chip_gen: v7x
topology: tpu7x:2x2x1
jax: 0.10.0
libtpu: 0.0.40
codegen_flags: <defaults>
</compile_context>

<pallas_src>
import functools
import math

import jax
import jax.numpy as jnp
from jax.experimental import pallas as pl
from jax.experimental.pallas import tpu as pltpu


def _gelu(x):
    # tanh-form GELU: the transcendental goes to the EUP (own bundle slot).
    # TODO(synk): switch to lax.erf (HF "gelu" is the erf form) once convenient;
    #             tanh form differs by <~1e-3 abs, fine for inference.
    return 0.5 * x * (1.0 + jnp.tanh(0.7978845608028654 * (x + 0.044715 * x * x * x)))


def _layer_norm(x, gamma, beta, eps):
    mu = jnp.mean(x, axis=-1, keepdims=True)
    var = jnp.mean((x - mu) ** 2, axis=-1, keepdims=True)
    return (x - mu) * jax.lax.rsqrt(var + eps) * gamma + beta


def bert_exit_layer_kernel(
    x_ref, mask_ref,
    wq_ref, bq_ref, wk_ref, bk_ref, wv_ref, bv_ref,
    wo_ref, bo_ref, g1_ref, b1_ref,
    wi_ref, bi_ref, wo2_ref, bo2_ref, g2_ref, b2_ref,
    out_ref, *, num_heads, eps):
    x = x_ref[0]                       # [S, H] f32 activations
    mask = mask_ref[0]                 # [1, S] additive mask
    S, H = x.shape
    dh = H // num_heads
    scale = 1.0 / math.sqrt(dh)

    # --- BertSelfAttention: QKV projections (bf16 MXU, f32 accumulation) ---
    x_bf = x.astype(jnp.bfloat16)
    q = jnp.dot(x_bf, wq_ref[...], preferred_element_type=jnp.float32) + bq_ref[...]
    k = jnp.dot(x_bf, wk_ref[...], preferred_element_type=jnp.float32) + bk_ref[...]
    v = jnp.dot(x_bf, wv_ref[...], preferred_element_type=jnp.float32) + bv_ref[...]

    # Head-major layouts via 2-D transpose + leading-dim reshape (+ a single
    # last-two-dim swap) -- no per-head Python loop.
    q_hT = q.T.reshape(num_heads, dh, S)              # [nh, dh, S]
    k_hT = k.T.reshape(num_heads, dh, S)              # [nh, dh, S]
    v_hT = v.T.reshape(num_heads, dh, S)              # [nh, dh, S]
    q_h = jnp.transpose(q_hT, (0, 2, 1)) * scale      # [nh, S, dh], pre-scaled

    # scores[h, i, j] = sum_d q[i, h*dh+d] * k[j, h*dh+d]   (batched over heads)
    sc = jax.lax.dot_general(
        q_h.astype(jnp.bfloat16), k_hT.astype(jnp.bfloat16),
        (((2,), (1,)), ((0,), (0,))),
        preferred_element_type=jnp.float32)            # [nh, S, S]
    sc = sc + mask                                     # broadcast over heads & queries
    sc = sc - jnp.max(sc, axis=-1, keepdims=True)      # f32 softmax
    e = jnp.exp(sc)
    p = e / jnp.sum(e, axis=-1, keepdims=True)         # attn dropout = identity (eval)

    # ctxT[h, d, i] = sum_j v[j, h*dh+d] * p[h, i, j]
    ctxT = jax.lax.dot_general(
        v_hT.astype(jnp.bfloat16), p.astype(jnp.bfloat16),
        (((2,), (2,)), ((0,), (0,))),
        preferred_element_type=jnp.float32)            # [nh, dh, S]
    ctx = ctxT.reshape(H, S).T                         # [S, H] concatenated heads

    # --- BertSelfOutput: ONE full-K output projection + residual + LayerNorm ---
    attn_proj = jnp.dot(ctx.astype(jnp.bfloat16), wo_ref[...],
                        preferred_element_type=jnp.float32)
    attn_out = _layer_norm(attn_proj + bo_ref[...] + x, g1_ref[...], b1_ref[...], eps)

    # --- BertIntermediate (GELU) + BertOutput + LayerNorm ---
    inter = _gelu(jnp.dot(attn_out.astype(jnp.bfloat16), wi_ref[...],
                          preferred_element_type=jnp.float32) + bi_ref[...])
    ffn = jnp.dot(inter.astype(jnp.bfloat16), wo2_ref[...],
                  preferred_element_type=jnp.float32) + bo2_ref[...]
    out_ref[0] = _layer_norm(ffn + attn_out, g2_ref[...], b2_ref[...], eps)


def exit_head_kernel(first_ref, wp_ref, bp_ref, wc_ref, bc_ref, logits_ref, feat_ref):
    # BertPooler (dense + tanh) + dropout(identity) + classifier, batched over
    # ALL batch rows at once so wp/wc are pushed through the MXU a single time.
    first = first_ref[...].astype(jnp.bfloat16)                      # [B, H]
    pooled = jnp.tanh(jnp.dot(first, wp_ref[...],
                              preferred_element_type=jnp.float32) + bp_ref[...])
    feat_ref[...] = pooled
    logits_ref[...] = jnp.dot(pooled.astype(jnp.bfloat16), wc_ref[...],
                              preferred_element_type=jnp.float32) + bc_ref[...]


_LAYER_WEIGHT_NAMES = ["wq", "bq", "wk", "bk", "wv", "bv", "wo", "bo", "g1", "b1",
                       "wi", "bi", "wo2", "bo2", "g2", "b2"]


def bert_exit_layer(x, mask, params, num_heads, eps):
    B, S, H = x.shape
    weights = [params[n] for n in _LAYER_WEIGHT_NAMES]
    kernel = functools.partial(bert_exit_layer_kernel, num_heads=num_heads, eps=eps)

    # Weight blocks never change across the batch grid -> single-buffer them so
    # VMEM holds one copy of each weight instead of the default two.
    weight_specs = [
        pl.BlockSpec(w.shape, lambda b: (0, 0), pipeline_mode=pl.Buffered(1))
        for w in weights
    ]
    in_specs = [
        pl.BlockSpec((1, S, H), lambda b: (b, 0, 0)),   # hidden_states
        pl.BlockSpec((1, 1, S), lambda b: (b, 0, 0)),   # additive attention mask
    ] + weight_specs
    out_specs = pl.BlockSpec((1, S, H), lambda b: (b, 0, 0))

    return pl.pallas_call(
        kernel,
        grid=(B,),
        in_specs=in_specs,
        out_specs=out_specs,
        out_shape=jax.ShapeDtypeStruct((B, S, H), jnp.float32),
        compiler_params=pltpu.CompilerParams(dimension_semantics=("parallel",)),
    )(x, mask, *weights)


def bert_exit_head(hidden_states, params):
    B, S, H = hidden_states.shape
    L = params["wc"].shape[1]
    first = hidden_states[:, 0, :]                      # BertPooler takes token 0
    logits, feat = pl.pallas_call(
        exit_head_kernel,
        out_shape=(jax.ShapeDtypeStruct((B, L), jnp.float32),
                   jax.ShapeDtypeStruct((B, H), jnp.float32)),
    )(first, params["wp"], params["bp"], params["wc"], params["bc"])
    return logits, feat


def bert_exit_encoder(hidden_states, attention_mask, layer_params, num_heads,
                      eps=1e-12, exits=None, stop_exit=None):
    """Mirrors BertExitEncoder.forward -> (exits_logits, exits_feature)."""
    exits = exits if exits is not None else tuple(range(len(layer_params)))
    exits_logits, exits_feature = (), ()
    for i, p in enumerate(layer_params):
        hidden_states = bert_exit_layer(hidden_states, attention_mask, p, num_heads, eps)
        if i in exits:
            # GradientRescaleFunction is identity in the forward pass.
            logits, f = bert_exit_head(hidden_states, p)
            exits_logits += (logits,)
            exits_feature += (f,)
        if stop_exit is not None and i == exits[stop_exit]:
            break
    return exits_logits, exits_feature


def init_layer_params(key, H, I, L, std=0.02):
    ks = jax.random.split(key, 8)

    def lin(k, din, dout):
        # Matmul weights stored in bf16 (MXU-native; halves weight VMEM/HBM traffic).
        return (jax.random.normal(k, (din, dout), jnp.float32) * std).astype(jnp.bfloat16)

    z = lambda n: jnp.zeros((1, n), jnp.float32)
    return dict(
        wq=lin(ks[0], H, H), bq=z(H),
        wk=lin(ks[1], H, H), bk=z(H),
        wv=lin(ks[2], H, H), bv=z(H),
        wo=lin(ks[3], H, H), bo=z(H),
        g1=jnp.ones((1, H), jnp.float32), b1=z(H),
        wi=lin(ks[4], H, I), bi=z(I),
        wo2=lin(ks[5], I, H), bo2=z(H),
        g2=jnp.ones((1, H), jnp.float32), b2=z(H),
        wp=lin(ks[6], H, H), bp=z(H),     # classifier_pooler (BertPooler)
        wc=lin(ks[7], H, L), bc=z(L),     # classifier -> num_labels
    )


if __name__ == "__main__":
    B, S, H, NUM_HEADS, INTER, NUM_LABELS, NUM_LAYERS = 2, 8, 32, 4, 64, 2, 2

    key = jax.random.PRNGKey(0)
    k_x, k_p = jax.random.split(key)
    x = jax.random.normal(k_x, (B, S, H), jnp.float32)

    # HF-style extended additive mask: 0 = attend, -1e4 = masked.
    mask = jnp.zeros((B, 1, S), jnp.float32)
    mask = mask.at[1, 0, S - 2:].set(-10000.0)

    layer_keys = jax.random.split(k_p, NUM_LAYERS)
    layer_params = [init_layer_params(k, H, INTER, NUM_LABELS) for k in layer_keys]

    exits_logits, exits_feature = bert_exit_encoder(x, mask, layer_params, NUM_HEADS)
    jax.block_until_ready((exits_logits, exits_feature))

    assert len(exits_logits) == NUM_LAYERS and exits_logits[0].shape == (B, NUM_LABELS)
    assert len(exits_feature) == NUM_LAYERS and exits_feature[0].shape == (B, H)
    assert all(bool(jnp.all(jnp.isfinite(l))) for l in exits_logits)
    assert all(bool(jnp.all(jnp.isfinite(f))) for f in exits_feature)
    print("KERNEL_OK")
</pallas_src>

<mosaic_0001>
module attributes {stable_mosaic.version = 11 : i64} {
  func.func @bert_exit_layer_kernel(%arg0: i32, %arg1: memref<1x8x32xf32, #tpu.memory_space<vmem>>, %arg2: memref<1x1x8xf32, #tpu.memory_space<vmem>>, %arg3: memref<32x32xbf16, #tpu.memory_space<vmem>>, %arg4: memref<1x32xf32, #tpu.memory_space<vmem>>, %arg5: memref<32x32xbf16, #tpu.memory_space<vmem>>, %arg6: memref<1x32xf32, #tpu.memory_space<vmem>>, %arg7: memref<32x32xbf16, #tpu.memory_space<vmem>>, %arg8: memref<1x32xf32, #tpu.memory_space<vmem>>, %arg9: memref<32x32xbf16, #tpu.memory_space<vmem>>, %arg10: memref<1x32xf32, #tpu.memory_space<vmem>>, %arg11: memref<1x32xf32, #tpu.memory_space<vmem>>, %arg12: memref<1x32xf32, #tpu.memory_space<vmem>>, %arg13: memref<32x64xbf16, #tpu.memory_space<vmem>>, %arg14: memref<1x64xf32, #tpu.memory_space<vmem>>, %arg15: memref<64x32xbf16, #tpu.memory_space<vmem>>, %arg16: memref<1x32xf32, #tpu.memory_space<vmem>>, %arg17: memref<1x32xf32, #tpu.memory_space<vmem>>, %arg18: memref<1x32xf32, #tpu.memory_space<vmem>>, %arg19: memref<1x8x32xf32, #tpu.memory_space<vmem>>) attributes {dimension_semantics = [#tpu.dimension_semantics<parallel>], iteration_bounds = array<i64: 2>, scalar_prefetch = 0 : i64, scratch_operands = 0 : i64, tpu.core_type = #tpu.core_type<tc>, window_params = [{transform_indices = @transform_0, window_bounds = array<i64: 1, 8, 32>}, {transform_indices = @transform_1, window_bounds = array<i64: 1, 1, 8>}, {pipeline_mode = #tpu.pipeline_mode<synchronous>, transform_indices = @transform_2, window_bounds = array<i64: 32, 32>}, {pipeline_mode = #tpu.pipeline_mode<synchronous>, transform_indices = @transform_3, window_bounds = array<i64: 1, 32>}, {pipeline_mode = #tpu.pipeline_mode<synchronous>, transform_indices = @transform_4, window_bounds = array<i64: 32, 32>}, {pipeline_mode = #tpu.pipeline_mode<synchronous>, transform_indices = @transform_5, window_bounds = array<i64: 1, 32>}, {pipeline_mode = #tpu.pipeline_mode<synchronous>, transform_indices = @transform_6, window_bounds = array<i64: 32, 32>}, {pipeline_mode = #tpu.pipeline_mode<synchronous>, transform_indices = @transform_7, window_bounds = array<i64: 1, 32>}, {pipeline_mode = #tpu.pipeline_mode<synchronous>, transform_indices = @transform_8, window_bounds = array<i64: 32, 32>}, {pipeline_mode = #tpu.pipeline_mode<synchronous>, transform_indices = @transform_9, window_bounds = array<i64: 1, 32>}, {pipeline_mode = #tpu.pipeline_mode<synchronous>, transform_indices = @transform_10, window_bounds = array<i64: 1, 32>}, {pipeline_mode = #tpu.pipeline_mode<synchronous>, transform_indices = @transform_11, window_bounds = array<i64: 1, 32>}, {pipeline_mode = #tpu.pipeline_mode<synchronous>, transform_indices = @transform_12, window_bounds = array<i64: 32, 64>}, {pipeline_mode = #tpu.pipeline_mode<synchronous>, transform_indices = @transform_13, window_bounds = array<i64: 1, 64>}, {pipeline_mode = #tpu.pipeline_mode<synchronous>, transform_indices = @transform_14, window_bounds = array<i64: 64, 32>}, {pipeline_mode = #tpu.pipeline_mode<synchronous>, transform_indices = @transform_15, window_bounds = array<i64: 1, 32>}, {pipeline_mode = #tpu.pipeline_mode<synchronous>, transform_indices = @transform_16, window_bounds = array<i64: 1, 32>}, {pipeline_mode = #tpu.pipeline_mode<synchronous>, transform_indices = @transform_17, window_bounds = array<i64: 1, 32>}, {transform_indices = @transform_18, window_bounds = array<i64: 1, 8, 32>}]} {
    %c0 = arith.constant 0 : index
    %c0_0 = arith.constant 0 : index
    %c0_1 = arith.constant 0 : index
    %0 = vector.load %arg1[%c0, %c0_0, %c0_1] : memref<1x8x32xf32, #tpu.memory_space<vmem>>, vector<1x8x32xf32>
    %1 = vector.shape_cast %0 : vector<1x8x32xf32> to vector<8x32xf32>
    %c0_2 = arith.constant 0 : index
    %c0_3 = arith.constant 0 : index
    %c0_4 = arith.constant 0 : index
    %2 = vector.load %arg2[%c0_2, %c0_3, %c0_4] : memref<1x1x8xf32, #tpu.memory_space<vmem>>, vector<1x1x8xf32>
    %3 = vector.shape_cast %2 : vector<1x1x8xf32> to vector<1x8xf32>
    %4 = arith.truncf %1 : vector<8x32xf32> to vector<8x32xbf16>
    %c0_5 = arith.constant 0 : index
    %c0_6 = arith.constant 0 : index
    %5 = vector.load %arg3[%c0_5, %c0_6] : memref<32x32xbf16, #tpu.memory_space<vmem>>, vector<32x32xbf16>
    %cst = arith.constant dense<0.000000e+00> : vector<8x32xf32>
    %6 = tpu.matmul %4, %5, %cst {dimension_numbers = #tpu.dot_dimension_numbers<[1], [0], [0], [1], [0, 0, 1, 1], [], []>} : vector<8x32xbf16>, vector<32x32xbf16>, vector<8x32xf32> -> vector<8x32xf32>
    %c0_7 = arith.constant 0 : index
    %c0_8 = arith.constant 0 : index
    %7 = vector.load %arg4[%c0_7, %c0_8] : memref<1x32xf32, #tpu.memory_space<vmem>>, vector<1x32xf32>
    %8 = vector.broadcast %7 : vector<1x32xf32> to vector<8x32xf32>
    %9 = arith.addf %6, %8 : vector<8x32xf32>
    %c0_9 = arith.constant 0 : index
    %c0_10 = arith.constant 0 : index
    %10 = vector.load %arg5[%c0_9, %c0_10] : memref<32x32xbf16, #tpu.memory_space<vmem>>, vector<32x32xbf16>
    %cst_11 = arith.constant dense<0.000000e+00> : vector<8x32xf32>
    %11 = tpu.matmul %4, %10, %cst_11 {dimension_numbers = #tpu.dot_dimension_numbers<[1], [0], [0], [1], [0, 0, 1, 1], [], []>} : vector<8x32xbf16>, vector<32x32xbf16>, vector<8x32xf32> -> vector<8x32xf32>
    %c0_12 = arith.constant 0 : index
    %c0_13 = arith.constant 0 : index
    %12 = vector.load %arg6[%c0_12, %c0_13] : memref<1x32xf32, #tpu.memory_space<vmem>>, vector<1x32xf32>
    %13 = vector.broadcast %12 : vector<1x32xf32> to vector<8x32xf32>
    %14 = arith.addf %11, %13 : vector<8x32xf32>
    %c0_14 = arith.constant 0 : index
    %c0_15 = arith.constant 0 : index
    %15 = vector.load %arg7[%c0_14, %c0_15] : memref<32x32xbf16, #tpu.memory_space<vmem>>, vector<32x32xbf16>
    %cst_16 = arith.constant dense<0.000000e+00> : vector<8x32xf32>
    %16 = tpu.matmul %4, %15, %cst_16 {dimension_numbers = #tpu.dot_dimension_numbers<[1], [0], [0], [1], [0, 0, 1, 1], [], []>} : vector<8x32xbf16>, vector<32x32xbf16>, vector<8x32xf32> -> vector<8x32xf32>
    %c0_17 = arith.constant 0 : index
    %c0_18 = arith.constant 0 : index
    %17 = vector.load %arg8[%c0_17, %c0_18] : memref<1x32xf32, #tpu.memory_space<vmem>>, vector<1x32xf32>
    %18 = vector.broadcast %17 : vector<1x32xf32> to vector<8x32xf32>
    %19 = arith.addf %16, %18 : vector<8x32xf32>
    %20 = tpu.transpose %9, [1, 0] : vector<8x32xf32> -> vector<32x8xf32>
    %21 = vector.shape_cast %20 : vector<32x8xf32> to vector<4x8x8xf32>
    %22 = tpu.transpose %14, [1, 0] : vector<8x32xf32> -> vector<32x8xf32>
    %23 = vector.shape_cast %22 : vector<32x8xf32> to vector<4x8x8xf32>
    %24 = tpu.transpose %19, [1, 0] : vector<8x32xf32> -> vector<32x8xf32>
    %25 = vector.shape_cast %24 : vector<32x8xf32> to vector<4x8x8xf32>
    %26 = tpu.transpose %21, [0, 2, 1] : vector<4x8x8xf32> -> vector<4x8x8xf32>
    %cst_19 = arith.constant 0.353553385 : f32
    %27 = vector.broadcast %cst_19 : f32 to vector<4x8x8xf32>
    %28 = arith.mulf %26, %27 : vector<4x8x8xf32>
    %29 = arith.truncf %28 : vector<4x8x8xf32> to vector<4x8x8xbf16>
    %30 = arith.truncf %23 : vector<4x8x8xf32> to vector<4x8x8xbf16>
    %cst_20 = arith.constant dense<0.000000e+00> : vector<4x8x8xf32>
    %31 = tpu.matmul %29, %30, %cst_20 {dimension_numbers = #tpu.dot_dimension_numbers<[2], [1], [1], [2], [0, 0, 0, 1, 1, 2], [0], [0]>} : vector<4x8x8xbf16>, vector<4x8x8xbf16>, vector<4x8x8xf32> -> vector<4x8x8xf32>
    %32 = vector.shape_cast %3 : vector<1x8xf32> to vector<1x1x8xf32>
    %33 = vector.broadcast %32 : vector<1x1x8xf32> to vector<4x8x8xf32>
    %34 = arith.addf %31, %33 : vector<4x8x8xf32>
    %cst_21 = arith.constant dense<0xFF800000> : vector<4x8xf32>
    %35 = vector.multi_reduction <maximumf>, %34, %cst_21 [2] : vector<4x8x8xf32> to vector<4x8xf32>
    %36 = vector.shape_cast %35 : vector<4x8xf32> to vector<4x8x1xf32>
    %37 = vector.broadcast %36 : vector<4x8x1xf32> to vector<4x8x8xf32>
    %38 = arith.subf %34, %37 : vector<4x8x8xf32>
    %39 = math.exp %38 : vector<4x8x8xf32>
    %cst_22 = arith.constant dense<0.000000e+00> : vector<4x8xf32>
    %40 = vector.multi_reduction <add>, %39, %cst_22 [2] : vector<4x8x8xf32> to vector<4x8xf32>
    %41 = vector.shape_cast %40 : vector<4x8xf32> to vector<4x8x1xf32>
    %42 = vector.broadcast %41 : vector<4x8x1xf32> to vector<4x8x8xf32>
    %43 = arith.divf %39, %42 : vector<4x8x8xf32>
    %44 = arith.truncf %25 : vector<4x8x8xf32> to vector<4x8x8xbf16>
    %45 = arith.truncf %43 : vector<4x8x8xf32> to vector<4x8x8xbf16>
    %cst_23 = arith.constant dense<0.000000e+00> : vector<4x8x8xf32>
    %46 = tpu.matmul %44, %45, %cst_23 {dimension_numbers = #tpu.dot_dimension_numbers<[2], [2], [1], [1], [0, 0, 0, 1, 1, 1], [0], [0]>} : vector<4x8x8xbf16>, vector<4x8x8xbf16>, vector<4x8x8xf32> -> vector<4x8x8xf32>
    %47 = vector.shape_cast %46 : vector<4x8x8xf32> to vector<32x8xf32>
    %48 = tpu.transpose %47, [1, 0] : vector<32x8xf32> -> vector<8x32xf32>
    %49 = arith.truncf %48 : vector<8x32xf32> to vector<8x32xbf16>
    %c0_24 = arith.constant 0 : index
    %c0_25 = arith.constant 0 : index
    %50 = vector.load %arg9[%c0_24, %c0_25] : memref<32x32xbf16, #tpu.memory_space<vmem>>, vector<32x32xbf16>
    %cst_26 = arith.constant dense<0.000000e+00> : vector<8x32xf32>
    %51 = tpu.matmul %49, %50, %cst_26 {dimension_numbers = #tpu.dot_dimension_numbers<[1], [0], [0], [1], [0, 0, 1, 1], [], []>} : vector<8x32xbf16>, vector<32x32xbf16>, vector<8x32xf32> -> vector<8x32xf32>
    %c0_27 = arith.constant 0 : index
    %c0_28 = arith.constant 0 : index
    %52 = vector.load %arg10[%c0_27, %c0_28] : memref<1x32xf32, #tpu.memory_space<vmem>>, vector<1x32xf32>
    %53 = vector.broadcast %52 : vector<1x32xf32> to vector<8x32xf32>
    %54 = arith.addf %51, %53 : vector<8x32xf32>
    %55 = arith.addf %54, %1 : vector<8x32xf32>
    %c0_29 = arith.constant 0 : index
    %c0_30 = arith.constant 0 : index
    %56 = vector.load %arg11[%c0_29, %c0_30] : memref<1x32xf32, #tpu.memory_space<vmem>>, vector<1x32xf32>
    %c0_31 = arith.constant 0 : index
    %c0_32 = arith.constant 0 : index
    %57 = vector.load %arg12[%c0_31, %c0_32] : memref<1x32xf32, #tpu.memory_space<vmem>>, vector<1x32xf32>
    %cst_33 = arith.constant dense<0.000000e+00> : vector<8xf32>
    %58 = vector.multi_reduction <add>, %55, %cst_33 [1] : vector<8x32xf32> to vector<8xf32>
    %59 = vector.shape_cast %58 : vector<8xf32> to vector<8x1xf32>
    %cst_34 = arith.constant 3.200000e+01 : f32
    %60 = vector.broadcast %cst_34 : f32 to vector<8x1xf32>
    %61 = arith.divf %59, %60 : vector<8x1xf32>
    %62 = vector.broadcast %61 : vector<8x1xf32> to vector<8x32xf32>
    %63 = arith.subf %55, %62 : vector<8x32xf32>
    %64 = arith.mulf %63, %63 : vector<8x32xf32>
    %cst_35 = arith.constant dense<0.000000e+00> : vector<8xf32>
    %65 = vector.multi_reduction <add>, %64, %cst_35 [1] : vector<8x32xf32> to vector<8xf32>
    %66 = vector.shape_cast %65 : vector<8xf32> to vector<8x1xf32>
    %cst_36 = arith.constant 3.200000e+01 : f32
    %67 = vector.broadcast %cst_36 : f32 to vector<8x1xf32>
    %68 = arith.divf %66, %67 : vector<8x1xf32>
    %69 = vector.broadcast %61 : vector<8x1xf32> to vector<8x32xf32>
    %70 = arith.subf %55, %69 : vector<8x32xf32>
    %cst_37 = arith.constant 9.99999996E-13 : f32
    %71 = vector.broadcast %cst_37 : f32 to vector<8x1xf32>
    %72 = arith.addf %68, %71 : vector<8x1xf32>
    %73 = math.rsqrt %72 : vector<8x1xf32>
    %74 = vector.broadcast %73 : vector<8x1xf32> to vector<8x32xf32>
    %75 = arith.mulf %70, %74 : vector<8x32xf32>
    %76 = vector.broadcast %56 : vector<1x32xf32> to vector<8x32xf32>
    %77 = arith.mulf %75, %76 : vector<8x32xf32>
    %78 = vector.broadcast %57 : vector<1x32xf32> to vector<8x32xf32>
    %79 = arith.addf %77, %78 : vector<8x32xf32>
    %80 = arith.truncf %79 : vector<8x32xf32> to vector<8x32xbf16>
    %c0_38 = arith.constant 0 : index
    %c0_39 = arith.constant 0 : index
    %81 = vector.load %arg13[%c0_38, %c0_39] : memref<32x64xbf16, #tpu.memory_space<vmem>>, vector<32x64xbf16>
    %cst_40 = arith.constant dense<0.000000e+00> : vector<8x64xf32>
    %82 = tpu.matmul %80, %81, %cst_40 {dimension_numbers = #tpu.dot_dimension_numbers<[1], [0], [0], [1], [0, 0, 1, 1], [], []>} : vector<8x32xbf16>, vector<32x64xbf16>, vector<8x64xf32> -> vector<8x64xf32>
    %c0_41 = arith.constant 0 : index
    %c0_42 = arith.constant 0 : index
    %83 = vector.load %arg14[%c0_41, %c0_42] : memref<1x64xf32, #tpu.memory_space<vmem>>, vector<1x64xf32>
    %84 = vector.broadcast %83 : vector<1x64xf32> to vector<8x64xf32>
    %85 = arith.addf %82, %84 : vector<8x64xf32>
    %cst_43 = arith.constant 5.000000e-01 : f32
    %86 = vector.broadcast %cst_43 : f32 to vector<8x64xf32>
    %87 = arith.mulf %86, %85 : vector<8x64xf32>
    %cst_44 = arith.constant 4.471500e-02 : f32
    %88 = vector.broadcast %cst_44 : f32 to vector<8x64xf32>
    %89 = arith.mulf %88, %85 : vector<8x64xf32>
    %90 = arith.mulf %89, %85 : vector<8x64xf32>
    %91 = arith.mulf %90, %85 : vector<8x64xf32>
    %92 = arith.addf %85, %91 : vector<8x64xf32>
    %cst_45 = arith.constant 0.797884583 : f32
    %93 = vector.broadcast %cst_45 : f32 to vector<8x64xf32>
    %94 = arith.mulf %93, %92 : vector<8x64xf32>
    %95 = math.tanh %94 : vector<8x64xf32>
    %cst_46 = arith.constant 1.000000e+00 : f32
    %96 = vector.broadcast %cst_46 : f32 to vector<8x64xf32>
    %97 = arith.addf %96, %95 : vector<8x64xf32>
    %98 = arith.mulf %87, %97 : vector<8x64xf32>
    %99 = arith.truncf %98 : vector<8x64xf32> to vector<8x64xbf16>
    %c0_47 = arith.constant 0 : index
    %c0_48 = arith.constant 0 : index
    %100 = vector.load %arg15[%c0_47, %c0_48] : memref<64x32xbf16, #tpu.memory_space<vmem>>, vector<64x32xbf16>
    %cst_49 = arith.constant dense<0.000000e+00> : vector<8x32xf32>
    %101 = tpu.matmul %99, %100, %cst_49 {dimension_numbers = #tpu.dot_dimension_numbers<[1], [0], [0], [1], [0, 0, 1, 1], [], []>} : vector<8x64xbf16>, vector<64x32xbf16>, vector<8x32xf32> -> vector<8x32xf32>
    %c0_50 = arith.constant 0 : index
    %c0_51 = arith.constant 0 : index
    %102 = vector.load %arg16[%c0_50, %c0_51] : memref<1x32xf32, #tpu.memory_space<vmem>>, vector<1x32xf32>
    %103 = vector.broadcast %102 : vector<1x32xf32> to vector<8x32xf32>
    %104 = arith.addf %101, %103 : vector<8x32xf32>
    %105 = arith.addf %104, %79 : vector<8x32xf32>
    %c0_52 = arith.constant 0 : index
    %c0_53 = arith.constant 0 : index
    %106 = vector.load %arg17[%c0_52, %c0_53] : memref<1x32xf32, #tpu.memory_space<vmem>>, vector<1x32xf32>
    %c0_54 = arith.constant 0 : index
    %c0_55 = arith.constant 0 : index
    %107 = vector.load %arg18[%c0_54, %c0_55] : memref<1x32xf32, #tpu.memory_space<vmem>>, vector<1x32xf32>
    %cst_56 = arith.constant dense<0.000000e+00> : vector<8xf32>
    %108 = vector.multi_reduction <add>, %105, %cst_56 [1] : vector<8x32xf32> to vector<8xf32>
    %109 = vector.shape_cast %108 : vector<8xf32> to vector<8x1xf32>
    %cst_57 = arith.constant 3.200000e+01 : f32
    %110 = vector.broadcast %cst_57 : f32 to vector<8x1xf32>
    %111 = arith.divf %109, %110 : vector<8x1xf32>
    %112 = vector.broadcast %111 : vector<8x1xf32> to vector<8x32xf32>
    %113 = arith.subf %105, %112 : vector<8x32xf32>
    %114 = arith.mulf %113, %113 : vector<8x32xf32>
    %cst_58 = arith.constant dense<0.000000e+00> : vector<8xf32>
    %115 = vector.multi_reduction <add>, %114, %cst_58 [1] : vector<8x32xf32> to vector<8xf32>
    %116 = vector.shape_cast %115 : vector<8xf32> to vector<8x1xf32>
    %cst_59 = arith.constant 3.200000e+01 : f32
    %117 = vector.broadcast %cst_59 : f32 to vector<8x1xf32>
    %118 = arith.divf %116, %117 : vector<8x1xf32>
    %119 = vector.broadcast %111 : vector<8x1xf32> to vector<8x32xf32>
    %120 = arith.subf %105, %119 : vector<8x32xf32>
    %cst_60 = arith.constant 9.99999996E-13 : f32
    %121 = vector.broadcast %cst_60 : f32 to vector<8x1xf32>
    %122 = arith.addf %118, %121 : vector<8x1xf32>
    %123 = math.rsqrt %122 : vector<8x1xf32>
    %124 = vector.broadcast %123 : vector<8x1xf32> to vector<8x32xf32>
    %125 = arith.mulf %120, %124 : vector<8x32xf32>
    %126 = vector.broadcast %106 : vector<1x32xf32> to vector<8x32xf32>
    %127 = arith.mulf %125, %126 : vector<8x32xf32>
    %128 = vector.broadcast %107 : vector<1x32xf32> to vector<8x32xf32>
    %129 = arith.addf %127, %128 : vector<8x32xf32>
    %c0_61 = arith.constant 0 : index
    %c0_62 = arith.constant 0 : index
    %c0_63 = arith.constant 0 : index
    %130 = vector.load %arg19[%c0_61, %c0_62, %c0_63] : memref<1x8x32xf32, #tpu.memory_space<vmem>>, vector<1x8x32xf32>
    %131 = vector.shape_cast %130 : vector<1x8x32xf32> to vector<8x32xf32>
    %132 = vector.shape_cast %129 : vector<8x32xf32> to vector<1x8x32xf32>
    tpu.vector_store %arg19[%c0_61, %c0_62, %c0_63], %132 {strides = array<i32>} : memref<1x8x32xf32, #tpu.memory_space<vmem>>, vector<1x8x32xf32>,
    return
  }
  func.func @transform_0(%arg0: i32) -> (i32, i32, i32) {
    %c0_i32 = arith.constant 0 : i32
    %c0_i32_0 = arith.constant 0 : i32
    %c0_i32_1 = arith.constant 0 : i32
    return %arg0, %c0_i32, %c0_i32_0 : i32, i32, i32
  }
  func.func @transform_1(%arg0: i32) -> (i32, i32, i32) {
    %c0_i32 = arith.constant 0 : i32
    %c0_i32_0 = arith.constant 0 : i32
    %c0_i32_1 = arith.constant 0 : i32
    return %arg0, %c0_i32, %c0_i32_0 : i32, i32, i32
  }
  func.func @transform_2(%arg0: i32) -> (i32, i32) {
    %c0_i32 = arith.constant 0 : i32
    %c0_i32_0 = arith.constant 0 : i32
    %c0_i32_1 = arith.constant 0 : i32
    return %c0_i32, %c0_i32_0 : i32, i32
  }
  func.func @transform_3(%arg0: i32) -> (i32, i32) {
    %c0_i32 = arith.constant 0 : i32
    %c0_i32_0 = arith.constant 0 : i32
    %c0_i32_1 = arith.constant 0 : i32
    return %c0_i32, %c0_i32_0 : i32, i32
  }
  func.func @transform_4(%arg0: i32) -> (i32, i32) {
    %c0_i32 = arith.constant 0 : i32
    %c0_i32_0 = arith.constant 0 : i32
    %c0_i32_1 = arith.constant 0 : i32
    return %c0_i32, %c0_i32_0 : i32, i32
  }
  func.func @transform_5(%arg0: i32) -> (i32, i32) {
    %c0_i32 = arith.constant 0 : i32
    %c0_i32_0 = arith.constant 0 : i32
    %c0_i32_1 = arith.constant 0 : i32
    return %c0_i32, %c0_i32_0 : i32, i32
  }
  func.func @transform_6(%arg0: i32) -> (i32, i32) {
    %c0_i32 = arith.constant 0 : i32
    %c0_i32_0 = arith.constant 0 : i32
    %c0_i32_1 = arith.constant 0 : i32
    return %c0_i32, %c0_i32_0 : i32, i32
  }
  func.func @transform_7(%arg0: i32) -> (i32, i32) {
    %c0_i32 = arith.constant 0 : i32
    %c0_i32_0 = arith.constant 0 : i32
    %c0_i32_1 = arith.constant 0 : i32
    return %c0_i32, %c0_i32_0 : i32, i32
  }
  func.func @transform_8(%arg0: i32) -> (i32, i32) {
    %c0_i32 = arith.constant 0 : i32
    %c0_i32_0 = arith.constant 0 : i32
    %c0_i32_1 = arith.constant 0 : i32
    return %c0_i32, %c0_i32_0 : i32, i32
  }
  func.func @transform_9(%arg0: i32) -> (i32, i32) {
    %c0_i32 = arith.constant 0 : i32
    %c0_i32_0 = arith.constant 0 : i32
    %c0_i32_1 = arith.constant 0 : i32
    return %c0_i32, %c0_i32_0 : i32, i32
  }
  func.func @transform_10(%arg0: i32) -> (i32, i32) {
    %c0_i32 = arith.constant 0 : i32
    %c0_i32_0 = arith.constant 0 : i32
    %c0_i32_1 = arith.constant 0 : i32
    return %c0_i32, %c0_i32_0 : i32, i32
  }
  func.func @transform_11(%arg0: i32) -> (i32, i32) {
    %c0_i32 = arith.constant 0 : i32
    %c0_i32_0 = arith.constant 0 : i32
    %c0_i32_1 = arith.constant 0 : i32
    return %c0_i32, %c0_i32_0 : i32, i32
  }
  func.func @transform_12(%arg0: i32) -> (i32, i32) {
    %c0_i32 = arith.constant 0 : i32
    %c0_i32_0 = arith.constant 0 : i32
    %c0_i32_1 = arith.constant 0 : i32
    return %c0_i32, %c0_i32_0 : i32, i32
  }
  func.func @transform_13(%arg0: i32) -> (i32, i32) {
    %c0_i32 = arith.constant 0 : i32
    %c0_i32_0 = arith.constant 0 : i32
    %c0_i32_1 = arith.constant 0 : i32
    return %c0_i32, %c0_i32_0 : i32, i32
  }
  func.func @transform_14(%arg0: i32) -> (i32, i32) {
    %c0_i32 = arith.constant 0 : i32
    %c0_i32_0 = arith.constant 0 : i32
    %c0_i32_1 = arith.constant 0 : i32
    return %c0_i32, %c0_i32_0 : i32, i32
  }
  func.func @transform_15(%arg0: i32) -> (i32, i32) {
    %c0_i32 = arith.constant 0 : i32
    %c0_i32_0 = arith.constant 0 : i32
    %c0_i32_1 = arith.constant 0 : i32
    return %c0_i32, %c0_i32_0 : i32, i32
  }
  func.func @transform_16(%arg0: i32) -> (i32, i32) {
    %c0_i32 = arith.constant 0 : i32
    %c0_i32_0 = arith.constant 0 : i32
    %c0_i32_1 = arith.constant 0 : i32
    return %c0_i32, %c0_i32_0 : i32, i32
  }
  func.func @transform_17(%arg0: i32) -> (i32, i32) {
    %c0_i32 = arith.constant 0 : i32
    %c0_i32_0 = arith.constant 0 : i32
    %c0_i32_1 = arith.constant 0 : i32
    return %c0_i32, %c0_i32_0 : i32, i32
  }
  func.func @transform_18(%arg0: i32) -> (i32, i32, i32) {
    %c0_i32 = arith.constant 0 : i32
    %c0_i32_0 = arith.constant 0 : i32
    %c0_i32_1 = arith.constant 0 : i32
    return %arg0, %c0_i32, %c0_i32_0 : i32, i32, i32
  }
}

</mosaic_0001>

<bundles_post_ra>
// kernel: tpu_custom_call.1
= control target key start
LH: loop header
LB: loop body
LE: loop exit
PB: predicated region body
PF: predicated region fallthrough
CT: control target
= control target key end

     0   :  { %s3096_s0 = inlined_call_operand.vmem [shape: f32[2,8,32], index: 0, kind: input, shape index: {}]   ;;  %s3097_s1 = inlined_call_operand.vmem [shape: f32[2,1,8], index: 1, kind: input, shape index: {}]   ;;  %s3098_s2 = inlined_call_operand.vmem [shape: bf16[32,32], index: 2, kind: input, shape index: {}]   ;;  %s3099_s3 = inlined_call_operand.hbm [shape: f32[1,32], index: 3, kind: input, shape index: {}]   ;;  %s3100_s4 = inlined_call_operand.vmem [shape: bf16[32,32], index: 4, kind: input, shape index: {}]   ;;  %s3101_s5 = inlined_call_operand.hbm [shape: f32[1,32], index: 5, kind: input, shape index: {}]   ;;  %s3102_s6 = inlined_call_operand.hbm [shape: bf16[32,32], index: 6, kind: input, shape index: {}]   ;;  %s3103_s7 = inlined_call_operand.hbm [shape: f32[1,32], index: 7, kind: input, shape index: {}]   ;;  %s3104_s8 = inlined_call_operand.hbm [shape: bf16[32,32], index: 8, kind: input, shape index: {}]   ;;  %s3105_s9 = inlined_call_operand.hbm [shape: f32[1,32], index: 9, kind: input, shape index: {}]   ;;  %s3106_s10 = inlined_call_operand.vmem [shape: f32[1,32], index: 10, kind: input, shape index: {}]   ;;  %s3107_s11 = inlined_call_operand.vmem [shape: f32[1,32], index: 11, kind: input, shape index: {}]   ;;  %s3108_s12 = inlined_call_operand.vmem [shape: bf16[32,64], index: 12, kind: input, shape index: {}]   ;;  %s3109_s13 = inlined_call_operand.vmem [shape: f32[1,64], index: 13, kind: input, shape index: {}]   ;;  %s3110_s14 = inlined_call_operand.vmem [shape: bf16[64,32], index: 14, kind: input, shape index: {}]   ;;  %s3111_s15 = inlined_call_operand.vmem [shape: f32[1,32], index: 15, kind: input, shape index: {}]   ;;  %s3112_s16 = inlined_call_operand.vmem [shape: f32[1,32], index: 16, kind: input, shape index: {}]   ;;  %s3113_s17 = inlined_call_operand.vmem [shape: f32[1,32], index: 17, kind: input, shape index: {}]   ;;  %s3114_s18 = inlined_call_operand.hbm [shape: f32[2,8,32], index: 18, kind: output, shape index: {}]  }
   0x1   :  { %3126 = sst [smem:[#allocation25_spill]] %s3096_s0 }
   0x2   :  { %3127 = sst [smem:[#allocation26_spill]] %s3097_s1 }
   0x3   :  { %3128 = sst [smem:[#allocation27_spill]] %s3098_s2 }
   0x4   :  { %3129 = sst [smem:[#allocation28_spill]] %s3099_s3 }
   0x5   :  { %3130 = sst [smem:[#allocation29_spill]] %s3101_s5 }
   0x6   :  { %3131 = sst [smem:[#allocation30_spill]] %s3112_s16 }
   0x7   :  { %3132 = sst [smem:[#allocation31_spill]] %s3113_s17 }
   0x8   :  { %3133 = sst [smem:[#allocation32_spill]] %s3114_s18 }
   0x9   :  { %23 = vsyncpa [#allocation3], 0 }
   0xa   :  { %24 = vsyncpa [#allocation6], 0 }
   0xb   :  { %25 = vsyncpa [#allocation9], 0 }
   0xc   :  { %26 = vsyncpa [#allocation12], 0 }
   0xd   :  { %27 = vsyncpa [#allocation4], 0 }
   0xe   :  { %29 = vsyncpa [#allocation4 + $0x1], 0  ;;  %s2680_s27 = smov 0   ;;  %s2682_s28 = smov 0  }
   0xf   :  { %s2684_s29 = smov 0   ;;  %s2686_s30 = smov 0  }
  0x10 LB: > { %3134 = sst [smem:[#allocation19_spill]] %s2560_s27  ;;  %s2701_s0 = sadd.s32 4294967295, %s2572_s30   ;;  %s2572_s30 = sphi %s2686_s30, %s3167_s30   ;;  %s2568_s29 = sphi %s2684_s29, %s3172_s29   ;;  %s2564_s28 = sphi %s2682_s28, %s3171_s28   ;;  %s2560_s27 = sphi %s2680_s27, %s3170_s27  }
  0x11   : > { %3135 = sst [smem:[#allocation20_spill]] %s2568_s29  ;;  %s1989_s19 = sadd.s32 4294967294, %s2572_s30  }
  0x12   : > { %3136 = sst [smem:[#allocation21_spill]] %s2572_s30  ;;  %s2705_s1 = sadd.s32 1, %s2572_s30  }
  0x13   : > { %3137 = sst [smem:[#allocation22_spill]] %s2705_s1  ;;  %s430_s20 = sadd.s32 1, %s2568_s29 }
  0x14   : > { %s427_s21 = ssub.s32 %s2572_s30, %s2705_s1  ;;  %p440_p0 = scmp.ne.s32.totalorder %s2568_s29, %s2564_s28 }
  0x15   : > { %p428_p1 = scmp.eq.s32.totalorder %s427_s21, 0  ;;  %p441_p2 = scmp.eq.s32.totalorder %s2701_s0, 1 }
  0x16   : > { %p446_p3 = scmp.ne.s32.totalorder %s2564_s28, %s2560_s27  ;;  %p447_p4 = scmp.eq.s32.totalorder %s1989_s19, 1 }
  0x17   : > { %s2716_s22 = scalar_select %p428_p1, %s2568_s29, %s430_s20  }
  0x18   : > { %p2718_p5 = por %p441_p2, %p440_p0  ;;  %p2722_p6 = por %p447_p4, %p446_p3 }
  0x19   : > { %3138 = sst [smem:[#allocation23_spill]] %s2716_s22  ;;  %p1990_p7 = scmp.ge.s32.totalorder %s2572_s30, 1 }
  0x1a   : > { %s3139_s2 = scalar_select %p2718_p5, 1, 0 }
  0x1b   : > { %s3140_s23 = scalar_select %p2722_p6, 1, 0 }
  0x1c   : > { %p454_p8 = scmp.lt.s32.totalorder %s2572_s30, 3  ;;  %p3123_p9 = scmp.eq.s32.totalorder %s2701_s0, 0 }
  0x1d   : > { %3141 = sst [smem:[#allocation24_spill]] %s3140_s23  ;;  %s2574_s25 = smov [#allocation5]  }
  0x1e   : > { %p2729_p10 = pnand %p1990_p7, %p454_p8  ;;  %s484_s26 = sshll.u32 %s2574_s25, 4  ;;  %s485_s26 = int_to_ptr.vmem [resolvable:$true] %s484_s26 }
  0x1f   : > { %s2575_s19 = smov [#allocation8]   ;;  %s2576_s22 = smov [#allocation2]  }
  0x20   : > { %s3142_s24 = scalar_select %p2729_p10, 1, 0 }
  0x21   : > { %p2212_p11 = pneg %p2729_p10  ;;  %s508_s20 = sshll.u32 %s2575_s19, 4  ;;  %s2741_s20 = int_to_ptr.vmem [resolvable:$true] %s508_s20 }
  0x22   : > { %s470_s29 = sshll.u32 %s2576_s22, 4  ;;  %s3144_s5 = sld [smem:[#allocation29_spill]]  ;;  %s2743_s29 = int_to_ptr.vmem [resolvable:$true] %s470_s29 }
  0x23   : > { %p2737_p12 = pnand %p3123_p9, %p2212_p11 }
  0x25   : > { %p2753_p0 = pneg %p2737_p12 }
  0x28   : > { %s2326_s25 = scalar_lea.hbm %s3144_s5, 16 }
  0x29   : > { %p2327_p13 = scmp.ne.s32.totalorder %s3144_s5, %s2326_s25  ;;  %p2333_p3 = scmp.lt.u32.totalorder %s2326_s25, %s3144_s5 }
  0x2b   : > { %p2329_p1 = pnand %p2753_p0, %p2327_p13 }
  0x2d   : > { %p2330_p2 = pneg %p2329_p1 }
  0x2f   : > { %p2335_p4 = pnand %p2333_p3, %p2330_p2 }
  0x31   : > { %2338 = shalt.err (!%p2335_p4)
}
  0x32   : > { %s2339_s1 = scalar_lea.vmem %s485_s26, 16  ;;  %s2346_s27 = scalar_lea.vmem %s485_s26, 32 }
  0x33   : > { %p2340_p7 = scmp.ne.s32.totalorder %s485_s26, %s2339_s1  ;;  %p2347_p9 = scmp.lt.s32.totalorder %s485_s26, %s485_s26 }
  0x34   : > { %p2348_p6 = scmp.lt.s32.totalorder %s2346_s27, %s2339_s1 }
  0x35   : > { %p2342_p8 = pnand %p2340_p7, %p2753_p0 }
  0x36   : > { %p2349_p5 = por %p2348_p6, %p2347_p9 }
  0x37   : > { %p2343_p11 = pneg %p2342_p8 }
  0x39   : > { %p2350_p10 = pnand %p2349_p5, %p2343_p11 }
  0x3b   : > { %2353 = shalt.err (!%p2350_p10)
}
  0x3c   : > { %2218 = dma.hbm_to_vmem [thread:$0]  (!%p2737_p12), %s3144_s5, 16, %s485_s26, [#allocation6]  }
  0x3d   : > { %s2354_s22 = scalar_lea.hbm %s3103_s7, 16 }
  0x3e   : > { %p2355_p13 = scmp.ne.s32.totalorder %s3103_s7, %s2354_s22  ;;  %p2361_p5 = scmp.lt.u32.totalorder %s2354_s22, %s3103_s7 }
  0x40   : > { %p2357_p1 = pnand %p2355_p13, %p2753_p0 }
  0x42   : > { %p2358_p6 = pneg %p2357_p1 }
  0x44   : > { %p2363_p9 = pnand %p2361_p5, %p2358_p6 }
  0x46   : > { %2366 = shalt.err (!%p2363_p9)
}
  0x47   : > { %s2367_s26 = scalar_lea.vmem %s2741_s20, 16  ;;  %s2374_s16 = scalar_lea.vmem %s2741_s20, 32 }
  0x48   : > { %p2368_p10 = scmp.ne.s32.totalorder %s2741_s20, %s2367_s26  ;;  %p2375_p4 = scmp.lt.s32.totalorder %s2741_s20, %s2741_s20 }
  0x49   : > { %p2376_p7 = scmp.lt.s32.totalorder %s2374_s16, %s2367_s26 }
  0x4a   : > { %p2370_p2 = pnand %p2368_p10, %p2753_p0 }
  0x4b   : > { %p2377_p8 = por %p2376_p7, %p2375_p4 }
  0x4c   : > { %p2371_p3 = pneg %p2370_p2 }
  0x4e   : > { %p2378_p11 = pnand %p2377_p8, %p2371_p3 }
  0x50   : > { %2381 = shalt.err (!%p2378_p11)
}
  0x51   : > { %2224 = dma.hbm_to_vmem [thread:$0]  (!%p2737_p12), %s3103_s7, 16, %s2741_s20, [#allocation9]  }
  0x52   : > { %s3146_s3 = sld [smem:[#allocation28_spill]] }
  0x58   : > { %s2382_s25 = scalar_lea.hbm %s3146_s3, 16 }
  0x59   : > { %p2383_p13 = scmp.ne.s32.totalorder %s3146_s3, %s2382_s25  ;;  %p2389_p5 = scmp.lt.u32.totalorder %s2382_s25, %s3146_s3 }
  0x5b   : > { %p2385_p1 = pnand %p2383_p13, %p2753_p0 }
  0x5d   : > { %p2386_p6 = pneg %p2385_p1 }
  0x5f   : > { %p2391_p9 = pnand %p2389_p5, %p2386_p6 }
  0x61   : > { %2394 = shalt.err (!%p2391_p9)
}
  0x62   : > { %s2395_s20 = scalar_lea.vmem %s2743_s29, 16  ;;  %s2402_s16 = scalar_lea.vmem %s2743_s29, 32 }
  0x63   : > { %p2396_p10 = scmp.ne.s32.totalorder %s2743_s29, %s2395_s20  ;;  %p2403_p4 = scmp.lt.s32.totalorder %s2743_s29, %s2743_s29 }
  0x64   : > { %p2404_p7 = scmp.lt.s32.totalorder %s2402_s16, %s2395_s20 }
  0x65   : > { %p2398_p2 = pnand %p2396_p10, %p2753_p0 }
  0x66   : > { %p2405_p8 = por %p2404_p7, %p2403_p4 }
  0x67   : > { %p2399_p3 = pneg %p2398_p2 }
  0x69   : > { %p2406_p11 = pnand %p2405_p8, %p2399_p3 }
  0x6b   : > { %2409 = shalt.err (!%p2406_p11)
}
  0x6c   : > { %2215 = dma.hbm_to_vmem [thread:$0]  (!%p2737_p12), %s3146_s3, 16, %s2743_s29, [#allocation3]  }
  0x6d   : > { %s2577_s23 = smov [#allocation7]   ;;  %s2410_s1 = scalar_lea.hbm %s3102_s6, 256 }
  0x6e   : > { %s494_s18 = sshll.u32 %s2577_s23, 4  ;;  %p2411_p13 = scmp.ne.s32.totalorder %s3102_s6, %s2410_s1  ;;  %s495_s18 = int_to_ptr.vmem [resolvable:$true] %s494_s18 }
  0x6f   : > { %p2417_p5 = scmp.lt.u32.totalorder %s2410_s1, %s3102_s6 }
  0x70   : > { %p2413_p1 = pnand %p2411_p13, %p2753_p0 }
  0x72   : > { %p2414_p6 = pneg %p2413_p1 }
  0x74   : > { %p2419_p9 = pnand %p2417_p5, %p2414_p6 }
  0x76   : > { %2422 = shalt.err (!%p2419_p9)
}
  0x77   : > { %s2423_s29 = scalar_lea.vmem %s495_s18, 256  ;;  %p2431_p4 = scmp.lt.s32.totalorder %s495_s18, %s495_s18 }
  0x78   : > { %p2424_p10 = scmp.ne.s32.totalorder %s495_s18, %s2423_s29  ;;  %p2432_p7 = scmp.lt.s32.totalorder %s2423_s29, %s2423_s29 }
  0x7a   : > { %p2426_p2 = pnand %p2424_p10, %p2753_p0  ;;  %p2433_p8 = por %p2432_p7, %p2431_p4 }
  0x7c   : > { %p2427_p3 = pneg %p2426_p2 }
  0x7e   : > { %p2434_p11 = pnand %p2433_p8, %p2427_p3 }
  0x80   : > { %2437 = shalt.err (!%p2434_p11)
}
  0x81   : > { %s2578_s17 = smov 64   ;;  %s2579_s30 = smov 4  }
  0x82   : > { %2221 = dma.hbm_to_vmem [thread:$0]  (!%p2737_p12), %s3102_s6, 256, %s495_s18, [#allocation6], %s2578_s17, %s2578_s17, %s2579_s30  }
  0x83   : > { %s2580_s22 = smov [#allocation10]   ;;  %s2581_s27 = smov [#allocation11]  }
  0x84   : > { %s518_s1 = sshll.u32 %s2580_s22, 4  ;;  %s532_s26 = sshll.u32 %s2581_s27, 4  ;;  %s519_s1 = int_to_ptr.vmem [resolvable:$true] %s518_s1  ;;  %s2835_s26 = int_to_ptr.vmem [resolvable:$true] %s532_s26 }
  0x85   : > { %s2438_s29 = scalar_lea.hbm %s3104_s8, 256 }
  0x86   : > { %p2439_p13 = scmp.ne.s32.totalorder %s3104_s8, %s2438_s29  ;;  %p2445_p5 = scmp.lt.u32.totalorder %s2438_s29, %s3104_s8 }
  0x88   : > { %p2441_p1 = pnand %p2439_p13, %p2753_p0 }
  0x8a   : > { %p2442_p6 = pneg %p2441_p1 }
  0x8c   : > { %p2447_p9 = pnand %p2445_p5, %p2442_p6 }
  0x8e   : > { %2450 = shalt.err (!%p2447_p9)
}
  0x8f   : > { %s2451_s25 = scalar_lea.vmem %s519_s1, 256  ;;  %p2459_p4 = scmp.lt.s32.totalorder %s519_s1, %s519_s1 }
  0x90   : > { %p2452_p10 = scmp.ne.s32.totalorder %s519_s1, %s2451_s25  ;;  %p2460_p7 = scmp.lt.s32.totalorder %s2451_s25, %s2451_s25 }
  0x92   : > { %p2454_p2 = pnand %p2452_p10, %p2753_p0  ;;  %p2461_p8 = por %p2460_p7, %p2459_p4 }
  0x94   : > { %p2455_p3 = pneg %p2454_p2 }
  0x96   : > { %p2462_p11 = pnand %p2461_p8, %p2455_p3 }
  0x98   : > { %2465 = shalt.err (!%p2462_p11)
}
  0x99   : > { %2227 = dma.hbm_to_vmem [thread:$0]  (!%p2737_p12), %s3104_s8, 256, %s519_s1, [#allocation9], %s2578_s17, %s2578_s17, %s2579_s30  }
  0x9a   : > { %s2466_s20 = scalar_lea.hbm %s3105_s9, 16 }
  0x9b   : > { %p2467_p13 = scmp.ne.s32.totalorder %s3105_s9, %s2466_s20  ;;  %p2473_p5 = scmp.lt.u32.totalorder %s2466_s20, %s3105_s9 }
  0x9d   : > { %p2469_p1 = pnand %p2467_p13, %p2753_p0 }
  0x9f   : > { %p2470_p6 = pneg %p2469_p1 }
  0xa1   : > { %p2475_p9 = pnand %p2473_p5, %p2470_p6 }
  0xa3   : > { %2478 = shalt.err (!%p2475_p9)
}
  0xa4   : > { %s2479_s17 = scalar_lea.vmem %s2835_s26, 16  ;;  %s2486_s30 = scalar_lea.vmem %s2835_s26, 32 }
  0xa5   : > { %p2480_p10 = scmp.ne.s32.totalorder %s2835_s26, %s2479_s17  ;;  %p2487_p4 = scmp.lt.s32.totalorder %s2835_s26, %s2835_s26 }
  0xa6   : > { %p2488_p7 = scmp.lt.s32.totalorder %s2486_s30, %s2479_s17 }
  0xa7   : > { %p2482_p2 = pnand %p2480_p10, %p2753_p0 }
  0xa8   : > { %p2489_p8 = por %p2488_p7, %p2487_p4 }
  0xa9   : > { %p2483_p3 = pneg %p2482_p2 }
  0xab   : > { %p2490_p11 = pnand %p2489_p8, %p2483_p3 }
  0xad   : > { %2493 = shalt.err (!%p2490_p11)
}
  0xae   : > { %2230 = dma.hbm_to_vmem [thread:$0]  (!%p2737_p12), %s3105_s9, 16, %s2835_s26, [#allocation12]  }
  0xaf   : > { %p3147_p13 = scmp.ne.s32.totalorder %s3142_s24, 0 }
  0xb0   : > { %p3148_p0 = scmp.eq.s32.totalorder (!%p3147_p13), %s2701_s0, 0 }
  0xb1   : > { %582 = sbr.rel (%p3147_p13) target bundleno = 2906 (0xb5a), region = 92 }
  0xb8   : > { %2539 = dma.done.wait (%p3148_p0), [#allocation3], 16   ;;  %p3149_p1 = pmov %p3148_p0 }
  0xb9   : > { %p3150_p6 = pmov %p3148_p0 }
  0xba   : > { %2541 = vsyncadd (%p3149_p1), [#allocation3], 4294967280 }
  0xbb   : > { %2543 = dma.done.wait (%p3150_p6), [#allocation6], 272   ;;  %p3151_p5 = pmov %p3148_p0 }
  0xbc   : > { %p3152_p9 = pmov %p3148_p0 }
  0xbd   : > { %2545 = vsyncadd (%p3151_p5), [#allocation6], 4294967024 }
  0xbe   : > { %2547 = dma.done.wait (%p3152_p9), [#allocation9], 272   ;;  %p3153_p12 = pmov %p3148_p0 }
  0xbf   : > { %p3154_p10 = pmov %p3148_p0 }
  0xc0   : > { %2549 = vsyncadd (%p3153_p12), [#allocation9], 4294967024 }
  0xc1   : > { %2551 = dma.done.wait (%p3154_p10), [#allocation12], 16   ;;  %p3155_p2 = pmov %p3148_p0 }
  0xc2   : > { %p658_p3 = scmp.lt.s32.totalorder %s2701_s0, 1  ;;  %v2582_v0 = vmov 0.0   ;;  %vm2583_vm0 = vmmov 0   ;;  %s3156_s3 = sld [smem:[#allocation25_spill]]  ;;  %v2292_v4 = vld [vmem:[%s3100_s4] sm:$0xff]   ;;  %vm692_vm1 = vcmask 261120  }
  0xc3   : > { %2553 = vsyncadd (%p3155_p2), [#allocation12], 4294967280  ;;  %2086 = vmatprep.subr.bf16.mxu0 %v2582_v0  ;;  %2090 = vmatprep.mubr.msk.bf16.mxu0 %vm2583_vm0, %v2582_v0  ;;  %s3157_s20 = sld [smem:[#allocation27_spill]]  ;;  %v2293_v5 = vld [vmem:[%s3100_s4 + $0x8] sm:$0xff]   ;;  %v2007_v7 = vld [vmem:[#allocation2] ss:$0 sm:$0xff] }
  0xc4   : > { %s2902_s24 = scalar_select %p658_p3, %s2701_s0, 1  ;;  %2094 = vmatprep.subr.bf16.mxu1 %v2582_v0  ;;  %2098 = vmatprep.mubr.msk.bf16.mxu1 %vm2583_vm0, %v2582_v0  ;;  %v2011_v17 = vld [vmem:[#allocation5] ss:$0 sm:$0xff]  ;;  %v2294_v19 = vld [vmem:[#allocation7] sm:$0xff]   ;;  %v2295_v20 = vld [vmem:[#allocation7 + $0x8] sm:$0xff]   ;;  %vm1108_vm2 = vcmask 1043456  }
  0xc5   : > { %2095 = vmatpush3.bf16.msra.mxu1 %v2292_v4  ;;  %vm1104_vm3 = vcmask 64512   ;;  %vm1772_vm4 = vcmask 523264   ;;  %s655_s22 = sand.u32 1, %s2564_s28   ;;  %s3159_s23 = sld [smem:[#allocation30_spill]] }
  0xc6   : > { %s2006_s21 = sshll.u32 %s2902_s24, 3  ;;  %2096 = vmatprep.subr.bf16.mxu1 %v2582_v0  ;;  %s2005_s27 = sshll.u32 %s655_s22, 3 }
  0xc7   : > { %s3160_s30 = sld [smem:[#allocation31_spill]]  ;;  %s2047_s1 = sshll.u32 %s2701_s0, 7 }
  0xc8   : > { %s661_s5 = scalar_lea.vmem %s3156_s3, %s2006_s21  ;;  %s3158_s21 = sld [smem:[#allocation26_spill]] }
  0xc9   : > { %v2290_v1 = vld [vmem:[%s3157_s20] sm:$0xff]   ;;  %v2291_v2 = vld [vmem:[%s3157_s20 + $0x8] sm:$0xff]   ;;  %2097 = vmatpush3.bf16.msra.mxu1 %v2293_v5  ;;  %s657_s25 = scalar_lea.vmem [#allocation13], %s2005_s27  ;;  %s3161_s26 = sld [smem:[#allocation32_spill]] }
  0xca   : > { %2087 = vmatpush3.bf16.msra.mxu0 %v2290_v1  ;;  %v2917_v3 = vld [vmem:[%s661_s5] sm:$0xff]  ;;  %2110 = vmatprep.subr.bf16.mxu1 %v2582_v0  ;;  %s1848_s5 = scalar_lea.sflag [#allocation4], %s655_s22  ;;  %p3162_p7 = scmp.ne.s32.totalorder %s3139_s2, 0 }
  0xcb   : > { %2088 = vmatprep.subr.bf16.mxu0 %v2582_v0  ;;  %v668_v6 = vpack.c.bf16 %v2917_v3, %v2917_v3  ;;  %s2584_s0 = smov [#allocation13]  }
  0xcc   : > { %s2498_s27 = sshll.u32 %s2584_s0, 4  ;;  %s2499_s27 = int_to_ptr.vmem [resolvable:$false] %s2498_s27 }
  0xcd   : > { %2099 = vmatmul.mubr.msk.bf16.vlgmr.msra.gmra.mrb[0].mxu1 %vm692_vm1, %v668_v6  ;;  %s2500_s29 = scalar_lea.vmem %s2499_s27, 256 }
  0xce   : > { %2089 = vmatpush3.bf16.msra.mxu0 %v2291_v2  ;;  %2112 = vmatprep.mubr.msk.bf16.mxu1 %vm2583_vm0, %v2582_v0  ;;  %s664_s19 = scalar_lea.vmem %s3158_s21, %s2902_s24  ;;  %s1861_s21 = sshll.u32 %s657_s25, 4  ;;  %s3055_s21 = int_to_ptr.vmem [resolvable:$true] %s1861_s21 }
  0xcf   : > { %2102 = vmatprep.subr.bf16.mxu0 %v2582_v0  ;;  %v2019_v53 = vld [vmem:[%s664_s19] ss:$0 sm:$0xff]  ;;  %s3053_s3 = scalar_lea.hbm %s3161_s26, %s2047_s1  ;;  %s2494_s16 = scalar_lea.vmem %s3055_s21, 128 }
  0xd0   : > { %p2495_p4 = scmp.ne.s32.totalorder %s3055_s21, %s2494_s16  ;;  %p2501_p13 = scmp.lt.s32.totalorder %s3055_s21, %s2499_s27 }
  0xd1   : > { %2091 = vmatmul.mubr.msk.bf16.vlgmr.msra.gmra.mrb[0].mxu0 %vm692_vm1, %v668_v6  ;;  %p2502_p0 = scmp.lt.s32.totalorder %s2500_s29, %s2494_s16 }
  0xd2   : > { %2106 = vmatprep.mubr.msk.bf16.mxu0 %vm2583_vm0, %v2582_v0  ;;  %2103 = vmatpush3.bf16.msra.mxu0 %v2294_v19  ;;  %p2496_p8 = pnand %p2495_p4, %p3162_p7 }
  0xd3   : > { %2104 = vmatprep.subr.bf16.mxu0 %v2582_v0  ;;  %p2503_p1 = por %p2502_p0, %p2501_p13 }
  0xd4   : > { %p2497_p11 = pneg %p2496_p8 }
  0xd6   : > { %2105 = vmatpush3.bf16.msra.mxu0 %v2295_v20  ;;  %p2504_p6 = pnand %p2503_p1, %p2497_p11 }
  0xd7   : > { %2116 = vmatprep.subr.bf16.mxu0 %v2582_v0 }
  0xd9   : > { %2107 = vmatmul.mubr.msk.bf16.vlgmr.msra.gmra.mrb[4].mxu0 %vm692_vm1, %v668_v6 }
  0xda   : > { %2118 = vmatprep.mubr.msk.bf16.mxu0 %vm2583_vm0, %v2582_v0 }
 0x1a0   : > { %v793_v13 = vpop.f32.mrb[0].mxu1 }
 0x1a1   : > { %v2100_v14 = vpop.f32.mrb[1].mxu1  ;;  %v794_v18 = vadd.f32 %v2011_v17, %v793_v13 }
 0x1a2   : > { %v796_v15 = vpop.f32.mrb[2].mxu1 }
 0x1a3   : > { %v2101_v16 = vpop.f32.mrb[3].mxu1 }
 0x1a4   : > { %v730_v8 = vpop.f32.mrb[0].mxu0 }
 0x1a5   : > { %v2092_v9 = vpop.f32.mrb[1].mxu0  ;;  %v731_v10 = vadd.f32 %v2007_v7, %v730_v8 }
 0x1a6   : > { %v733_v11 = vpop.f32.mrb[2].mxu0 }
 0x1a7   : > { %862 = vxpose.xlu0.b32.start.end [1/1] (short) (narrow) %v731_v10, 32  ;;  %v2093_v12 = vpop.f32.mrb[3].mxu0 }
 0x1ac   : > { %v2946_v31 = vpop.f32.mrb[4].mxu0 }
 0x1ad   : > { %v2108_v32 = vpop.f32.mrb[5].mxu0 }
 0x1ae   : > { %v859_v33 = vpop.f32.mrb[6].mxu0 }
 0x1af   : > { %v2109_v34 = vpop.f32.mrb[7].mxu0 }
 0x1b4   : > { %894 = vxpose.xlu0.b32.start.end [1/1] (short) (narrow) %v794_v18, 32 }
 0x227   : > { %v878_v21 = vpop.trf.xlu0 }
 0x228   : > { %958 = vxpose.xlu1.b32.start.end [1/1] (short) (narrow) %v878_v21, 8 }
 0x22b   : > { %v879_v22 = vpop.trf.xlu0 }
 0x22c   : > { %990 = vxpose.xlu1.b32.start.end [1/1] (short) (narrow) %v879_v22, 8 }
 0x22f   : > { %v880_v23 = vpop.trf.xlu0 }
 0x230   : > { %1022 = vxpose.xlu1.b32.start.end [1/1] (short) (narrow) %v880_v23, 8 }
 0x233   : > { %v881_v24 = vpop.trf.xlu0 }
 0x234   : > { %1054 = vxpose.xlu1.b32.start.end [1/1] (short) (narrow) %v881_v24, 8 }
 0x237   : > { %v910_v25 = vpop.trf.xlu0 }
 0x238   : > { %v1094_v26 = vpack.c.bf16 %v910_v25, %v910_v25 }
 0x23a   : > { %v1110_v27 = vsel %vm1108_vm2, %v1094_v26, 0 }
 0x23b   : > { %2111 = vmatpush3.bf16.msra.mxu1 %v1110_v27  ;;  %v911_v28 = vpop.trf.xlu0 }
 0x23c   : > { %v1095_v29 = vpack.c.bf16 %v911_v28, %v911_v28  ;;  %2122 = vmatprep.subr.bf16.mxu1 %v2582_v0 }
 0x23e   : > { %v1156_v30 = vsel %vm1108_vm2, %v1095_v29, 0 }
 0x23f   : > { %2117 = vmatpush3.bf16.msra.mxu0 %v1156_v30  ;;  %v912_v35 = vpop.trf.xlu0 }
 0x240   : > { %2128 = vmatprep.subr.bf16.mxu0 %v2582_v0  ;;  %v1096_v36 = vpack.c.bf16 %v912_v35, %v912_v35 }
 0x242   : > { %v1202_v41 = vsel %vm1108_vm2, %v1096_v36, 0 }
 0x243   : > { %v913_v38 = vpop.trf.xlu0 }
 0x244   : > { %v1097_v42 = vpack.c.bf16 %v913_v38, %v913_v38 }
 0x246   : > { %v1248_v46 = vsel %vm1108_vm2, %v1097_v42, 0 }
 0x2a8   : > { %v974_v37 = vpop.trf.xlu1 }
 0x2a9   : > { %v1086_v39 = vmul.f32 0.35355338, %v974_v37  ;;  %v2015_v37 = vld [vmem:[#allocation8] ss:$0 sm:$0xff] }
 0x2aa   : > { %v857_v38 = vadd.f32 %v2015_v37, %v2946_v31 }
 0x2ab   : > { %v1090_v40 = vpack.c.bf16 %v1086_v39, %v1086_v39 }
 0x2ac   : > { %v1006_v43 = vpop.trf.xlu1 }
 0x2ad   : > { %v1087_v44 = vmul.f32 0.35355338, %v1006_v43  ;;  %2113 = vmatmul.mubr.msk.bf16.vlgmr.msra.gmra.mrb[4].mxu1 %vm1104_vm3, %v1090_v40 }
 0x2ae   : > { %2123 = vmatpush3.bf16.msra.mxu1 %v1202_v41  ;;  %2124 = vmatprep.mubr.msk.bf16.mxu1 %vm2583_vm0, %v2582_v0 }
 0x2af   : > { %v1091_v45 = vpack.c.bf16 %v1087_v44, %v1087_v44  ;;  %2134 = vmatprep.subr.bf16.mxu1 %v2582_v0 }
 0x2b0   : > { %v1038_v47 = vpop.trf.xlu1 }
 0x2b1   : > { %v1088_v48 = vmul.f32 0.35355338, %v1038_v47  ;;  %2119 = vmatmul.mubr.msk.bf16.vlgmr.msra.gmra.mrb[8].mxu0 %vm1104_vm3, %v1091_v45 }
 0x2b2   : > { %2129 = vmatpush3.bf16.msra.mxu0 %v1248_v46  ;;  %2130 = vmatprep.mubr.msk.bf16.mxu0 %vm2583_vm0, %v2582_v0 }
 0x2b3   : > { %v1092_v49 = vpack.c.bf16 %v1088_v48, %v1088_v48  ;;  %2140 = vmatprep.subr.bf16.mxu0 %v2582_v0 }
 0x2b4   : > { %v1070_v50 = vpop.trf.xlu1 }
 0x2b5   : > { %v1089_v51 = vmul.f32 0.35355338, %v1070_v50  ;;  %2125 = vmatmul.mubr.msk.bf16.vlgmr.msra.gmra.mrb[8].mxu1 %vm1104_vm3, %v1092_v49 }
 0x2b6   : > { %2136 = vmatprep.mubr.msk.bf16.mxu1 %vm2583_vm0, %v2582_v0 }
 0x2b7   : > { %v1093_v52 = vpack.c.bf16 %v1089_v51, %v1089_v51 }
 0x2b9   : > { %2131 = vmatmul.mubr.msk.bf16.vlgmr.msra.gmra.mrb[12].mxu0 %vm1104_vm3, %v1093_v52 }
 0x2ba   : > { %2142 = vmatprep.mubr.msk.bf16.mxu0 %vm2583_vm0, %v2582_v0 }
 0x380   : > { %v1146_v54 = vpop.f32.mrb[4].mxu1 }
 0x381   : > { %v1147_v55 = vadd.f32 %v2019_v53, %v1146_v54  ;;  %v2114_v56 = vpop.f32.mrb[5].mxu1 }
 0x382   : > { %v1149_v57 = vpop.f32.mrb[6].mxu1 }
 0x383   : > { %v2115_v58 = vpop.f32.mrb[7].mxu1  ;;  %v1290_v59 = vsel %vm1104_vm3, %v1147_v55, -inf }
 0x384   : > { %1291 = vmax.xlane.f32.xlu1 %v1290_v59  ;;  %v1192_v60 = vpop.f32.mrb[8].mxu0 }
 0x385   : > { %v1193_v61 = vadd.f32 %v2019_v53, %v1192_v60  ;;  %v2120_v62 = vpop.f32.mrb[9].mxu0 }
 0x386   : > { %v1195_v63 = vpop.f32.mrb[10].mxu0 }
 0x387   : > { %v2121_v1 = vpop.f32.mrb[11].mxu0  ;;  %v1293_v2 = vsel %vm1104_vm3, %v1193_v61, -inf }
 0x388   : > { %v1238_v4 = vpop.f32.mrb[8].mxu1  ;;  %1294 = vmax.xlane.f32.xlu0 %v1293_v2 }
 0x389   : > { %v1239_v5 = vadd.f32 %v2019_v53, %v1238_v4  ;;  %v2126_v6 = vpop.f32.mrb[9].mxu1  ;;  %v2296_v4 = vld [vmem:[#allocation10] sm:$0xff]  }
 0x38a   : > { %v1241_v7 = vpop.f32.mrb[10].mxu1 }
 0x38b   : > { %v2127_v8 = vpop.f32.mrb[11].mxu1  ;;  %v1296_v9 = vsel %vm1104_vm3, %v1239_v5, -inf }
 0x38c   : > { %1297 = vmax.xlane.f32.xlu1 %v1296_v9  ;;  %v1284_v10 = vpop.f32.mrb[12].mxu0 }
 0x38d   : > { %v1285_v11 = vadd.f32 %v2019_v53, %v1284_v10  ;;  %v2132_v12 = vpop.f32.mrb[13].mxu0 }
 0x38e   : > { %v1287_v13 = vpop.f32.mrb[14].mxu0 }
 0x38f   : > { %v1299_v14 = vsel %vm1104_vm3, %v1285_v11, -inf  ;;  %v2133_v15 = vpop.f32.mrb[15].mxu0 }
 0x390   : > { %1300 = vmax.xlane.f32.xlu1 %v1299_v14 }
 0x411   : > { %v1292_v16 = vpop.xlane.xlu1 %1291 }
 0x412   : > { %v1302_v17 = vsub.f32 %v1147_v55, %v1292_v16 }
 0x414   : > { %v1306_v18 = vmul.f32 1.442695, %v1302_v17 }
 0x415   : > { %v1295_v19 = vpop.xlane.xlu0 %1294 }
 0x416   : > { %2304 = vpow2.f32 %v1306_v18  ;;  %v1303_v20 = vsub.f32 %v1193_v61, %v1295_v19 }
 0x418   : > { %v1308_v21 = vmul.f32 1.442695, %v1303_v20 }
 0x419   : > { %v1298_v22 = vpop.xlane.xlu1 %1297 }
 0x41a   : > { %2306 = vpow2.f32 %v1308_v21  ;;  %v1304_v23 = vsub.f32 %v1239_v5, %v1298_v22  ;;  %v2297_v5 = vld [vmem:[#allocation10 + $0x8] sm:$0xff]  }
 0x41c   : > { %v1310_v24 = vmul.f32 1.442695, %v1304_v23 }
 0x41d   : > { %v1301_v25 = vpop.xlane.xlu1 %1300 }
 0x41e   : > { %2308 = vpow2.f32 %v1310_v24  ;;  %v1305_v26 = vsub.f32 %v1285_v11, %v1301_v25  ;;  %v2028_v24 = vld [vmem:[#allocation11] ss:$0 sm:$0xff] }
 0x420   : > { %v2305_v27 = vpop.eup %2304  ;;  %v1312_v28 = vmul.f32 1.442695, %v1305_v26 }
 0x421   : > { %v1314_v29 = vsel %vm1104_vm3, %v2305_v27, 0.0 }
 0x422   : > { %2310 = vpow2.f32 %v1312_v28  ;;  %1315 = vadd.xlane.f32.xlu1 %v1314_v29 }
 0x424   : > { %v2307_v30 = vpop.eup %2306 }
 0x425   : > { %v1317_v32 = vsel %vm1104_vm3, %v2307_v30, 0.0 }
 0x426   : > { %1318 = vadd.xlane.f32.xlu1 %v1317_v32 }
 0x428   : > { %v2309_v33 = vpop.eup %2308 }
 0x429   : > { %v1320_v34 = vsel %vm1104_vm3, %v2309_v33, 0.0 }
 0x42a   : > { %1321 = vadd.xlane.f32.xlu1 %v1320_v34 }
 0x42c   : > { %v2311_v35 = vpop.eup %2310 }
 0x42d   : > { %v1323_v36 = vsel %vm1104_vm3, %v2311_v35, 0.0 }
 0x42e   : > { %1324 = vadd.xlane.f32.xlu0 %v1323_v36 }
 0x45d   : > { %926 = vxpose.xlu1.b32.start.end [1/1] (short) (narrow) %v857_v38, 32  ;;  %v2298_v38 = vld [vmem:[%s3108_s12] sm:$0xff]  }
 0x4af   : > { %v1316_v39 = vpop.xlane.xlu1 %1315 }
 0x4b0   : > { %2312 = vrcp.f32 %v1316_v39  ;;  %v2299_v39 = vld [vmem:[%s3108_s12 + $0x8] sm:$0xff]  }
 0x4b3   : > { %v1319_v40 = vpop.xlane.xlu1 %1318 }
 0x4b4   : > { %2314 = vrcp.f32 %v1319_v40 }
 0x4b7   : > { %v1322_v31 = vpop.xlane.xlu1 %1321 }
 0x4b8   : > { %2316 = vrcp.f32 %v1322_v31  ;;  %v2300_v31 = vld [vmem:[%s3110_s14] sm:$0xff]  }
 0x4ba   : > { %v2313_v41 = vpop.eup %2312 }
 0x4bb   : > { %v1327_v42 = vmul.f32 %v2313_v41, %v2305_v27  ;;  %v1325_v49 = vpop.xlane.xlu0 %1324 }
 0x4bc   : > { %2318 = vrcp.f32 %v1325_v49  ;;  %v2301_v49 = vld [vmem:[%s3110_s14 + $0x8] sm:$0xff]  }
 0x4bd   : > { %v1338_v43 = vpack.c.bf16 %v1327_v42, %v1327_v42 }
 0x4be   : > { %v2315_v44 = vpop.eup %2314 }
 0x4bf   : > { %v1346_v45 = vsel %vm1104_vm3, %v1338_v43, 0  ;;  %v1329_v46 = vmul.f32 %v2315_v44, %v2307_v30  ;;  %v2032_v43 = vld [vmem:[%s3106_s10] ss:$0 sm:$0xff] }
 0x4c0   : > { %2135 = vmatpush3.bf16.xpose.msra.mxu1 %v1346_v45  ;;  %v2033_v45 = vld [vmem:[%s3107_s11] ss:$0 sm:$0xff] }
 0x4c1   : > { %v1339_v47 = vpack.c.bf16 %v1329_v46, %v1329_v46  ;;  %2146 = vmatprep.subr.bf16.mxu1 %v2582_v0 }
 0x4c2   : > { %v2317_v50 = vpop.eup %2316 }
 0x4c3   : > { %v1392_v48 = vsel %vm1104_vm3, %v1339_v47, 0  ;;  %v1331_v51 = vmul.f32 %v2317_v50, %v2309_v33  ;;  %v2302_v50 = vld [vmem:[%s3110_s14 + $0x10] sm:$0xff]  }
 0x4c4   : > { %2141 = vmatpush3.bf16.xpose.msra.mxu0 %v1392_v48 }
 0x4c5   : > { %2152 = vmatprep.subr.bf16.mxu0 %v2582_v0  ;;  %v1340_v53 = vpack.c.bf16 %v1331_v51, %v1331_v51  ;;  %v2303_v51 = vld [vmem:[%s3110_s14 + $0x18] sm:$0xff]  }
 0x4c6   : > { %v2319_v52 = vpop.eup %2318 }
 0x4c7   : > { %v1333_v54 = vmul.f32 %v2319_v52, %v2311_v35  ;;  %v1438_v57 = vsel %vm1104_vm3, %v1340_v53, 0  ;;  %v2034_v52 = vld [vmem:[%s3109_s13] ss:$0 sm:$0xff] }
 0x4c9   : > { %v1341_v58 = vpack.c.bf16 %v1333_v54, %v1333_v54 }
 0x4cb   : > { %v1484_v61 = vsel %vm1104_vm3, %v1341_v58, 0 }
 0x4dd   : > { %v942_v55 = vpop.trf.xlu1 }
 0x4de   : > { %v1334_v56 = vpack.c.bf16 %v942_v55, %v942_v55 }
 0x4e0   : > { %2137 = vmatmul.mubr.msk.bf16.vlgmr.msra.gmra.mrb[12].mxu1 %vm1104_vm3, %v1334_v56 }
 0x4e1   : > { %2147 = vmatpush3.bf16.xpose.msra.mxu1 %v1438_v57  ;;  %v943_v59 = vpop.trf.xlu1  ;;  %2148 = vmatprep.mubr.msk.bf16.mxu1 %vm2583_vm0, %v2582_v0 }
 0x4e2   : > { %v1335_v60 = vpack.c.bf16 %v943_v59, %v943_v59  ;;  %2158 = vmatprep.subr.bf16.mxu1 %v2582_v0 }
 0x4e4   : > { %2143 = vmatmul.mubr.msk.bf16.vlgmr.msra.gmra.mrb[16].mxu0 %vm1104_vm3, %v1335_v60 }
 0x4e5   : > { %2153 = vmatpush3.bf16.xpose.msra.mxu0 %v1484_v61  ;;  %v944_v62 = vpop.trf.xlu1  ;;  %2154 = vmatprep.mubr.msk.bf16.mxu0 %vm2583_vm0, %v2582_v0 }
 0x4e6   : > { %v1336_v63 = vpack.c.bf16 %v944_v62, %v944_v62  ;;  %2166 = vmatprep.subr.bf16.mxu0 %v2582_v0 }
 0x4e8   : > { %2149 = vmatmul.mubr.msk.bf16.vlgmr.msra.gmra.mrb[16].mxu1 %vm1104_vm3, %v1336_v63 }
 0x4e9   : > { %v945_v1 = vpop.trf.xlu1  ;;  %2162 = vmatprep.mubr.msk.bf16.mxu1 %vm2583_vm0, %v2582_v0  ;;  %2159 = vmatpush3.bf16.msra.mxu1 %v2296_v4 }
 0x4ea   : > { %v1337_v2 = vpack.c.bf16 %v945_v1, %v945_v1  ;;  %2160 = vmatprep.subr.bf16.mxu1 %v2582_v0 }
 0x4ec   : > { %2155 = vmatmul.mubr.msk.bf16.vlgmr.msra.gmra.mrb[20].mxu0 %vm1104_vm3, %v1337_v2 }
 0x4ed   : > { %2170 = vmatprep.mubr.msk.bf16.mxu0 %vm2583_vm0, %v2582_v0  ;;  %2161 = vmatpush3.bf16.msra.mxu1 %v2297_v5  ;;  %v2038_v5 = vld [vmem:[%s3111_s15] ss:$0 sm:$0xff] }
 0x4ee   : > { %2174 = vmatprep.subr.bf16.mxu1 %v2582_v0  ;;  %2167 = vmatpush3.bf16.msra.mxu0 %v2298_v38 }
 0x4ef   : > { %2168 = vmatprep.subr.bf16.mxu0 %v2582_v0 }
 0x4f2   : > { %2169 = vmatpush3.bf16.msra.mxu0 %v2299_v39 }
 0x5b3   : > { %v1382_v6 = vpop.f32.mrb[12].mxu1 }
 0x5b4   : > { %1526 = vxpose.xlu0.b32.start [1/4] (short) (narrow) %v1382_v6, 8  ;;  %v2138_v7 = vpop.f32.mrb[13].mxu1 }
 0x5b5   : > { %v1385_v8 = vpop.f32.mrb[14].mxu1 }
 0x5b6   : > { %v2139_v9 = vpop.f32.mrb[15].mxu1 }
 0x5b7   : > { %v1428_v10 = vpop.f32.mrb[16].mxu0 }
 0x5b8   : > { %1527 = vxpose.xlu0.b32.cont [2/4] (short) (narrow) %v1428_v10, 8  ;;  %v2144_v11 = vpop.f32.mrb[17].mxu0 }
 0x5b9   : > { %v1431_v12 = vpop.f32.mrb[18].mxu0 }
 0x5ba   : > { %v2145_v13 = vpop.f32.mrb[19].mxu0 }
 0x5bb   : > { %v1474_v14 = vpop.f32.mrb[16].mxu1 }
 0x5bc   : > { %v2150_v15 = vpop.f32.mrb[17].mxu1  ;;  %1528 = vxpose.xlu0.b32.cont [3/4] (short) (narrow) %v1474_v14, 8 }
 0x5bd   : > { %v1477_v16 = vpop.f32.mrb[18].mxu1 }
 0x5be   : > { %v2151_v17 = vpop.f32.mrb[19].mxu1 }
 0x5bf   : > { %v1520_v18 = vpop.f32.mrb[20].mxu0 }
 0x5c0   : > { %1529 = vxpose.xlu0.b32.end [4/4] (short) (narrow) %v1520_v18, 8  ;;  %v2156_v19 = vpop.f32.mrb[21].mxu0 }
 0x5c1   : > { %v1523_v20 = vpop.f32.mrb[22].mxu0 }
 0x5c2   : > { %v2157_v21 = vpop.f32.mrb[23].mxu0 }
 0x634   : > { %v1542_v22 = vpop.trf.xlu0 }
 0x635   : > { %v1558_v23 = vpack.c.bf16 %v1542_v22, %v1542_v22  ;;  %v2044_v22 = vld [vmem:[%s3159_s23] ss:$0 sm:$0xff] }
 0x637   : > { %2163 = vmatmul.mubr.msk.bf16.vlgmr.msra.gmra.mrb[20].mxu1 %vm692_vm1, %v1558_v23 }
 0x638   : > { %2182 = vmatprep.mubr.msk.bf16.mxu1 %vm2583_vm0, %v2582_v0  ;;  %2175 = vmatpush3.bf16.msra.mxu1 %v2300_v31 }
 0x639   : > { %2176 = vmatprep.subr.bf16.mxu1 %v2582_v0 }
 0x63c   : > { %2177 = vmatpush3.bf16.msra.mxu1 %v2301_v49 }
 0x63d   : > { %2178 = vmatprep.subr.bf16.mxu1 %v2582_v0 }
 0x640   : > { %2179 = vmatpush3.bf16.msra.mxu1 %v2302_v50 }
 0x641   : > { %2180 = vmatprep.subr.bf16.mxu1 %v2582_v0 }
 0x644   : > { %2181 = vmatpush3.bf16.msra.mxu1 %v2303_v51 }
 0x70a   : > { %v1619_v25 = vpop.f32.mrb[20].mxu1 }
 0x70b   : > { %v1620_v26 = vadd.f32 %v2028_v24, %v1619_v25  ;;  %v2164_v27 = vpop.f32.mrb[21].mxu1  ;;  %v2045_v24 = vld [vmem:[%s3160_s30] ss:$0 sm:$0xff] }
 0x70c   : > { %v1622_v28 = vpop.f32.mrb[22].mxu1 }
 0x70d   : > { %v2165_v29 = vpop.f32.mrb[23].mxu1  ;;  %v1625_v30 = vadd.f32 %v1620_v26, %v2917_v3 }
 0x70f   : > { %v1628_v32 = vsel %vm692_vm1, %v1625_v30, 0.0 }
 0x710   : > { %1629 = vadd.xlane.f32.xlu1 %v1628_v32 }
 0x79d   : > { %v1630_v33 = vpop.xlane.xlu1 %1629 }
 0x79e   : > { %v1632_v34 = vmul.f32 0.03125, %v1630_v33 }
 0x7a0   : > { %v1633_v35 = vsub.f32 %v1625_v30, %v1632_v34 }
 0x7a2   : > { %v1634_v36 = vmul.f32 %v1633_v35, %v1633_v35 }
 0x7a4   : > { %v1635_v37 = vsel %vm692_vm1, %v1634_v36, 0.0 }
 0x7a5   : > { %1636 = vadd.xlane.f32.xlu0 %v1635_v37 }
 0x832   : > { %v1637_v3 = vpop.xlane.xlu0 %1636 }
 0x833   : > { %v1638_v40 = vmul.f32 0.03125, %v1637_v3 }
 0x835   : > { %v1639_v41 = vadd.f32 1e-12, %v1638_v40 }
 0x837   : > { %2320 = vrsqrt.f32 %v1639_v41 }
 0x841   : > { %v2321_v42 = vpop.eup %2320 }
 0x842   : > { %v1641_v44 = vmul.f32 %v2321_v42, %v1633_v35 }
 0x844   : > { %v1648_v46 = vmul.f32 %v2032_v43, %v1641_v44 }
 0x846   : > { %v1655_v47 = vadd.f32 %v2033_v45, %v1648_v46 }
 0x848   : > { %v1656_v48 = vpack.c.bf16 %v1655_v47, %v1655_v47 }
 0x84a   : > { %2171 = vmatmul.mubr.msk.bf16.vlgmr.msra.gmra.mrb[24].mxu0 %vm692_vm1, %v1656_v48 }
 0x91d   : > { %v1717_v53 = vpop.f32.mrb[24].mxu0 }
 0x91e   : > { %v1718_v54 = vadd.f32 %v2034_v52, %v1717_v53  ;;  %v2172_v55 = vpop.f32.mrb[25].mxu0 }
 0x91f   : > { %v1720_v56 = vpop.f32.mrb[26].mxu0 }
 0x920   : > { %v1724_v57 = vmul.f32 0.044715, %v1718_v54  ;;  %v2173_v58 = vpop.f32.mrb[27].mxu0  ;;  %v1723_v1 = vmul.f32 0.5, %v1718_v54 }
 0x922   : > { %v1725_v59 = vmul.f32 %v1724_v57, %v1718_v54 }
 0x924   : > { %v1726_v60 = vmul.f32 %v1725_v59, %v1718_v54 }
 0x926   : > { %v1727_v61 = vadd.f32 %v1726_v60, %v1718_v54 }
 0x928   : > { %v1728_v62 = vmul.f32 0.7978846, %v1727_v61 }
 0x92a   : > { %2322 = vtanh.f32 %v1728_v62 }
 0x934   : > { %v2323_v63 = vpop.eup %2322 }
 0x935   : > { %v1730_v2 = vadd.f32 1.0, %v2323_v63 }
 0x937   : > { %v1731_v0 = vmul.f32 %v1730_v2, %v1723_v1 }
 0x939   : > { %v1732_v4 = vpack.c.bf16 %v1731_v0, %v1731_v0 }
 0x93b   : > { %2183 = vmatmul.mubr.msk.bf16.vlgmr.msra.gmra.mrb[24].mxu1 %vm1772_vm4, %v1732_v4 }
 0xa0e   : > { %v1810_v6 = vpop.f32.mrb[24].mxu1 }
 0xa0f   : > { %v1811_v7 = vadd.f32 %v2038_v5, %v1810_v6  ;;  %v2184_v8 = vpop.f32.mrb[25].mxu1 }
 0xa10   : > { %v1813_v9 = vpop.f32.mrb[26].mxu1 }
 0xa11   : > { %v2185_v10 = vpop.f32.mrb[27].mxu1  ;;  %v1816_v11 = vadd.f32 %v1811_v7, %v1655_v47 }
 0xa13   : > { %v1819_v12 = vsel %vm692_vm1, %v1816_v11, 0.0 }
 0xa14   : > { %1820 = vadd.xlane.f32.xlu1 %v1819_v12 }
 0xaa1   : > { %v1821_v13 = vpop.xlane.xlu1 %1820 }
 0xaa2   : > { %v1822_v14 = vmul.f32 0.03125, %v1821_v13 }
 0xaa4   : > { %v1823_v15 = vsub.f32 %v1816_v11, %v1822_v14 }
 0xaa6   : > { %v1824_v16 = vmul.f32 %v1823_v15, %v1823_v15 }
 0xaa8   : > { %v1825_v17 = vsel %vm692_vm1, %v1824_v16, 0.0 }
 0xaa9   : > { %1826 = vadd.xlane.f32.xlu0 %v1825_v17 }
 0xb36   : > { %v1827_v18 = vpop.xlane.xlu0 %1826 }
 0xb37   : > { %v1828_v19 = vmul.f32 0.03125, %v1827_v18 }
 0xb39   : > { %v1829_v20 = vadd.f32 1e-12, %v1828_v19 }
 0xb3b   : > { %2324 = vrsqrt.f32 %v1829_v20 }
 0xb45   : > { %v2325_v21 = vpop.eup %2324 }
 0xb46   : > { %v1831_v23 = vmul.f32 %v2325_v21, %v1823_v15 }
 0xb48   : > { %v1838_v25 = vmul.f32 %v2044_v22, %v1831_v23 }
 0xb4a   : > { %v1845_v26 = vadd.f32 %v2045_v24, %v1838_v25 }
 0xb4c   : > { %1846 = vst.msk [vmem:[%s657_s25] sm:$0xff] %vm692_vm1, %v1845_v26 }
 0xb4d   : > { %2507 = shalt.err (!%p2504_p6)
}
 0xb4e   : > { %s2508_s22 = scalar_lea.hbm %s3053_s3, 128  ;;  %s2512_s17 = scalar_lea.hbm %s3161_s26, 256 }
 0xb4f   : > { %p2509_p5 = scmp.ne.s32.totalorder %s3053_s3, %s2508_s22  ;;  %p2513_p10 = scmp.lt.u32.totalorder %s3053_s3, %s3161_s26 }
 0xb50   : > { %p2514_p2 = scmp.lt.u32.totalorder %s2512_s17, %s2508_s22  ;;  %p2516_p4 = scmp.lt.u32.totalorder %s2508_s22, %s3053_s3 }
 0xb51   : > { %p2510_p9 = pnand %p2509_p5, %p3162_p7 }
 0xb52   : > { %p2515_p3 = por %p2514_p2, %p2513_p10 }
 0xb53   : > { %p2511_p12 = pneg %p2510_p9 }
 0xb54   : > { %p2517_p8 = por %p2516_p4, %p2515_p3 }
 0xb56   : > { %p2518_p11 = pnand %p2517_p8, %p2511_p12 }
 0xb58   : > { %2521 = shalt.err (!%p2518_p11)
}
 0xb59   : > { %2210 = dma.vmem_to_hbm [thread:$0]  (%p3162_p7), %s3055_s21, 128, %s3053_s3, %s1848_s5  }
 0xb5a PF: > { %s3163_s25 = sld [smem:[#allocation21_spill]]  ;;  %s3164_s19 = sld [smem:[#allocation19_spill]] }
 0xb5b   : > { %s3165_s24 = sld [smem:[#allocation24_spill]] }
 0xb60   : > { %p2247_p13 = scmp.ge.s32.totalorder %s3163_s25, 2  ;;  %s1873_s16 = sand.u32 1, %s3164_s19  }
 0xb61   : > { %p3166_p0 = scmp.ne.s32.totalorder %s3165_s24, 0  ;;  %s1874_s0 = scalar_lea.sflag [#allocation4], %s1873_s16 }
 0xb63   : > { %p2232_p1 = pnand %p2247_p13, %p3166_p0 }
 0xb65   : > { %2555 = dma.done.wait (!%p2232_p1), %s1874_s0, 128  }
 0xb66   : > { %2557 = vsyncadd (!%p2232_p1), %s1874_s0, 4294967168  ;;  %s3167_s30 = sld [smem:[#allocation22_spill]]  ;;  %s3168_s29 = sld [smem:[#allocation20_spill]] }
 0xb67   : > { %s3169_s22 = sld [smem:[#allocation23_spill]]  ;;  %s3170_s27 = smov %s2564_s28 }
 0xb6c   : > { %p32_p6 = scmp.ge.s32.totalorder %s3167_s30, 4   ;;  %s3171_s28 = smov %s3168_s29 }
 0xb6d   : > { %s3172_s29 = smov %s3169_s22 }
 0xb6e   :  { %34 = sbr.rel (!%p32_p6) target bundleno = 16 (0x10), region = 155 }
 0xb75   :  { %1879 = vsyncpa [#allocation3], 1 }
 0xb76   :  { %1881 = vsyncpa [#allocation3 + $0x1], 1 }
 0xb77   :  { %1882 = vsyncpa [#allocation6], 1 }
 0xb78   :  { %1883 = vsyncpa [#allocation9], 1 }
 0xb79   :  { %1884 = vsyncpa [#allocation12], 1 }
 0xb7a   :  { %1885 = vsyncpa [#allocation4], 1 }
 0xb7b   :  { %1887 = vsyncpa [#allocation4 + $0x1], 1 }

</bundles_post_ra>
